<compile_context>
chip_gen: v7x
topology: tpu7x:2x2x1
jax: 0.10.0
libtpu: 0.0.40
codegen_flags: <defaults>
</compile_context>

<pallas_src>
import jax
import jax.numpy as jnp
import numpy as np
from jax import lax
from jax.experimental import pallas as pl
from jax.experimental.pallas import tpu as pltpu


_UNROLL = 8  # static Python unroll inside the gather loop (tm must divide)


def voxels_kernel(idx_ref, vox_ref, out_ref):
    """One row tile.

    idx_ref : (m_pad,) int32 in SMEM — scalar-prefetched flat voxel indices;
              masked-out / padded rows already point at the all-zero row.
    vox_ref : (v_pad, 4) f32 in VMEM — whole flattened table
              (r, g, b, 10*sigma), constant block index (loaded once).
    out_ref : (tm, 4) f32 output block.
    """
    tm = out_ref.shape[0]
    base = pl.program_id(0) * tm

    def gather8(r8, carry):
        r0 = pl.multiple_of(r8 * _UNROLL, _UNROLL)
        for u in range(_UNROLL):                          # static unroll
            row = idx_ref[base + r0 + u]                  # SMEM scalar read
            out_ref[pl.ds(r0 + u, 1), :] = vox_ref[pl.ds(row, 1), :]
        return carry

    lax.fori_loop(0, tm // _UNROLL, gather8, 0)

    # Epilogue (vectorized, once per tile): sigmoid on rgb lanes, relu on the
    # sigma lane (the x10 is folded into the table in the wrapper).  Rows
    # outside the cube gathered the zero row -> sigmoid(0)=0.5 / relu(0)=0,
    # exactly matching the PyTorch module.
    vals = out_ref[...]
    lane = lax.broadcasted_iota(jnp.int32, vals.shape, 1)
    out_ref[...] = jnp.where(lane == 3, jnp.maximum(vals, 0.0),
                             jax.nn.sigmoid(vals))


def voxels_forward(X, voxels, *, scale=1.0, tm=128):
    """X: (M, 3) float; voxels: (N, N, N, 4) float.

    Returns (sigmoid(rgb) of shape (M, 3), relu(10*sigma) of shape (M, 1)).
    """
    M = X.shape[0]
    N = voxels.shape[0]
    V = N * N * N
    assert tm % _UNROLL == 0 and tm % 8 == 0

    # --- flattened table, sigma*10 folded in, >= 1 all-zero pad row at index V.
    chan_scale = jnp.array([1.0, 1.0, 1.0, 10.0], jnp.float32)
    vox_flat = voxels.reshape(V, 4).astype(jnp.float32) * chan_scale
    v_pad = ((V + 1 + 7) // 8) * 8            # sublane-aligned, >= V + 1
    zero_row = V                              # guaranteed all-zero table row
    vox_tbl = jnp.pad(vox_flat, ((0, v_pad - V), (0, 0)))   # (v_pad, 4)

    # --- per-row index math + cube mask, once, in pure JAX (hoisted out of
    #     the kernel entirely; this is also the scalar-prefetch payload).
    Xf = X.astype(jnp.float32)
    x, y, z = Xf[:, 0], Xf[:, 1], Xf[:, 2]
    half = scale / 2.0
    cond = (jnp.abs(x) < half) & (jnp.abs(y) < half) & (jnp.abs(z) < half)
    cell = scale / N

    def to_idx(c):
        # PyTorch negative-index wrap: index -1 hits the last voxel slice.
        return jnp.mod(jnp.floor(c / cell + N / 2.0).astype(jnp.int32) - 1, N)

    flat = to_idx(x) * (N * N) + to_idx(y) * N + to_idx(z)
    flat = jnp.where(cond, flat, zero_row).astype(jnp.int32)

    # --- pad rows to a whole number of row tiles; pad rows hit the zero row.
    m_pad = pl.cdiv(M, tm) * tm
    flat = jnp.pad(flat, (0, m_pad - M), constant_values=zero_row)

    out = pl.pallas_call(
        voxels_kernel,
        out_shape=jax.ShapeDtypeStruct((m_pad, 4), jnp.float32),
        grid_spec=pltpu.PrefetchScalarGridSpec(
            num_scalar_prefetch=1,                 # flat indices -> SMEM
            grid=(m_pad // tm,),
            in_specs=[
                # Whole table, constant block index -> DMA'd to VMEM once and
                # kept resident across all row tiles.
                pl.BlockSpec((v_pad, 4), lambda i, idx: (0, 0)),
            ],
            out_specs=pl.BlockSpec((tm, 4), lambda i, idx: (i, 0)),
        ),
        compiler_params=pltpu.CompilerParams(
            dimension_semantics=("parallel",),     # row tiles shard across TCs
        ),
    )(flat, vox_tbl)

    return out[:M, :3], out[:M, 3:4]


def voxels_forward_ref(X, voxels, *, scale=1.0):
    """Pure-JAX reference mirroring the PyTorch forward."""
    N = voxels.shape[0]
    x, y, z = X[:, 0], X[:, 1], X[:, 2]
    half = scale / 2.0
    cond = (jnp.abs(x) < half) & (jnp.abs(y) < half) & (jnp.abs(z) < half)
    cell = scale / N

    def to_idx(c):
        return jnp.mod(jnp.floor(c / cell + N / 2.0).astype(jnp.int32) - 1, N)

    ix, iy, iz = to_idx(x), to_idx(y), to_idx(z)
    gathered = voxels[ix, iy, iz]  # (M, 4)
    gathered = gathered * jnp.array([1.0, 1.0, 1.0, 10.0], jnp.float32)
    cd = jnp.where(cond[:, None], gathered, 0.0)
    return jax.nn.sigmoid(cd[:, :3]), jax.nn.relu(cd[:, 3:4])


if __name__ == "__main__":
    NB_VOXELS = 16   # small synthetic grid (module default is 100)
    SCALE = 1.0
    M = 300          # nb_rays * nb_bins — deliberately NOT a tile multiple

    key = jax.random.PRNGKey(0)
    k_vox, k_x = jax.random.split(key)

    # deterministic "parameter" init, matching torch.rand((N,N,N,4))
    voxels_param = jax.random.uniform(
        k_vox, (NB_VOXELS, NB_VOXELS, NB_VOXELS, 4), dtype=jnp.float32
    )
    # query points: some inside the [-0.5, 0.5]^3 cube, some outside
    X = jax.random.uniform(k_x, (M, 3), dtype=jnp.float32, minval=-0.75, maxval=0.75)

    rgb, sigma = voxels_forward(X, voxels_param, scale=SCALE)
    rgb = jax.block_until_ready(rgb)
    sigma = jax.block_until_ready(sigma)

    rgb_ref, sigma_ref = voxels_forward_ref(X, voxels_param, scale=SCALE)
    np.testing.assert_allclose(np.asarray(rgb), np.asarray(rgb_ref), rtol=1e-5, atol=1e-5)
    np.testing.assert_allclose(np.asarray(sigma), np.asarray(sigma_ref), rtol=1e-5, atol=1e-5)

    assert rgb.shape == (M, 3) and sigma.shape == (M, 1)
    print("KERNEL_OK")
</pallas_src>

<mosaic_0001>
module attributes {stable_mosaic.version = 11 : i64} {
  func.func @voxels_kernel(%arg0: i32, %arg1: memref<384xi32, #tpu.memory_space<smem>>, %arg2: memref<4104x4xf32, #tpu.memory_space<vmem>>, %arg3: memref<128x4xf32, #tpu.memory_space<vmem>>) attributes {dimension_semantics = [#tpu.dimension_semantics<parallel>], iteration_bounds = array<i64: 3>, scalar_prefetch = 1 : i64, scratch_operands = 0 : i64, tpu.core_type = #tpu.core_type<tc>, window_params = [{pipeline_mode = #tpu.pipeline_mode<synchronous>, transform_indices = @transform_0, window_bounds = array<i64: 4104, 4>}, {transform_indices = @transform_1, window_bounds = array<i64: 128, 4>}]} {
    %c128_i32 = arith.constant 128 : i32
    %0 = arith.muli %arg0, %c128_i32 : i32
    %c0_i32 = arith.constant 0 : i32
    %c16_i32 = arith.constant 16 : i32
    %1 = arith.addi %c0_i32, %c16_i32 : i32
    %c1_i32 = arith.constant 1 : i32
    scf.for %arg4 = %c0_i32 to %1 step %c1_i32  : i32 {
      %c8_i32 = arith.constant 8 : i32
      %15 = arith.muli %arg4, %c8_i32 : i32
      %16 = tpu.assume_multiple %15, 8 : i32
      %17 = arith.addi %0, %16 : i32
      %c0_i32_5 = arith.constant 0 : i32
      %18 = arith.addi %17, %c0_i32_5 : i32
      %19 = arith.index_cast %18 : i32 to index
      %20 = memref.load %arg1[%19] : memref<384xi32, #tpu.memory_space<smem>>
      %21 = arith.index_cast %20 : i32 to index
      %c0_6 = arith.constant 0 : index
      %22 = vector.load %arg2[%21, %c0_6] : memref<4104x4xf32, #tpu.memory_space<vmem>>, vector<1x4xf32>
      %c0_i32_7 = arith.constant 0 : i32
      %23 = arith.addi %16, %c0_i32_7 : i32
      %24 = arith.index_cast %23 : i32 to index
      %c0_8 = arith.constant 0 : index
      %25 = vector.load %arg3[%24, %c0_8] : memref<128x4xf32, #tpu.memory_space<vmem>>, vector<1x4xf32>
      tpu.vector_store %arg3[%24, %c0_8], %22 {strides = array<i32>} : memref<128x4xf32, #tpu.memory_space<vmem>>, vector<1x4xf32>,
      %26 = arith.addi %0, %16 : i32
      %c1_i32_9 = arith.constant 1 : i32
      %27 = arith.addi %26, %c1_i32_9 : i32
      %28 = arith.index_cast %27 : i32 to index
      %29 = memref.load %arg1[%28] : memref<384xi32, #tpu.memory_space<smem>>
      %30 = arith.index_cast %29 : i32 to index
      %c0_10 = arith.constant 0 : index
      %31 = vector.load %arg2[%30, %c0_10] : memref<4104x4xf32, #tpu.memory_space<vmem>>, vector<1x4xf32>
      %c1_i32_11 = arith.constant 1 : i32
      %32 = arith.addi %16, %c1_i32_11 : i32
      %33 = arith.index_cast %32 : i32 to index
      %c0_12 = arith.constant 0 : index
      %34 = vector.load %arg3[%33, %c0_12] : memref<128x4xf32, #tpu.memory_space<vmem>>, vector<1x4xf32>
      tpu.vector_store %arg3[%33, %c0_12], %31 {strides = array<i32>} : memref<128x4xf32, #tpu.memory_space<vmem>>, vector<1x4xf32>,
      %35 = arith.addi %0, %16 : i32
      %c2_i32 = arith.constant 2 : i32
      %36 = arith.addi %35, %c2_i32 : i32
      %37 = arith.index_cast %36 : i32 to index
      %38 = memref.load %arg1[%37] : memref<384xi32, #tpu.memory_space<smem>>
      %39 = arith.index_cast %38 : i32 to index
      %c0_13 = arith.constant 0 : index
      %40 = vector.load %arg2[%39, %c0_13] : memref<4104x4xf32, #tpu.memory_space<vmem>>, vector<1x4xf32>
      %c2_i32_14 = arith.constant 2 : i32
      %41 = arith.addi %16, %c2_i32_14 : i32
      %42 = arith.index_cast %41 : i32 to index
      %c0_15 = arith.constant 0 : index
      %43 = vector.load %arg3[%42, %c0_15] : memref<128x4xf32, #tpu.memory_space<vmem>>, vector<1x4xf32>
      tpu.vector_store %arg3[%42, %c0_15], %40 {strides = array<i32>} : memref<128x4xf32, #tpu.memory_space<vmem>>, vector<1x4xf32>,
      %44 = arith.addi %0, %16 : i32
      %c3_i32_16 = arith.constant 3 : i32
      %45 = arith.addi %44, %c3_i32_16 : i32
      %46 = arith.index_cast %45 : i32 to index
      %47 = memref.load %arg1[%46] : memref<384xi32, #tpu.memory_space<smem>>
      %48 = arith.index_cast %47 : i32 to index
      %c0_17 = arith.constant 0 : index
      %49 = vector.load %arg2[%48, %c0_17] : memref<4104x4xf32, #tpu.memory_space<vmem>>, vector<1x4xf32>
      %c3_i32_18 = arith.constant 3 : i32
      %50 = arith.addi %16, %c3_i32_18 : i32
      %51 = arith.index_cast %50 : i32 to index
      %c0_19 = arith.constant 0 : index
      %52 = vector.load %arg3[%51, %c0_19] : memref<128x4xf32, #tpu.memory_space<vmem>>, vector<1x4xf32>
      tpu.vector_store %arg3[%51, %c0_19], %49 {strides = array<i32>} : memref<128x4xf32, #tpu.memory_space<vmem>>, vector<1x4xf32>,
      %53 = arith.addi %0, %16 : i32
      %c4_i32 = arith.constant 4 : i32
      %54 = arith.addi %53, %c4_i32 : i32
      %55 = arith.index_cast %54 : i32 to index
      %56 = memref.load %arg1[%55] : memref<384xi32, #tpu.memory_space<smem>>
      %57 = arith.index_cast %56 : i32 to index
      %c0_20 = arith.constant 0 : index
      %58 = vector.load %arg2[%57, %c0_20] : memref<4104x4xf32, #tpu.memory_space<vmem>>, vector<1x4xf32>
      %c4_i32_21 = arith.constant 4 : i32
      %59 = arith.addi %16, %c4_i32_21 : i32
      %60 = arith.index_cast %59 : i32 to index
      %c0_22 = arith.constant 0 : index
      %61 = vector.load %arg3[%60, %c0_22] : memref<128x4xf32, #tpu.memory_space<vmem>>, vector<1x4xf32>
      tpu.vector_store %arg3[%60, %c0_22], %58 {strides = array<i32>} : memref<128x4xf32, #tpu.memory_space<vmem>>, vector<1x4xf32>,
      %62 = arith.addi %0, %16 : i32
      %c5_i32 = arith.constant 5 : i32
      %63 = arith.addi %62, %c5_i32 : i32
      %64 = arith.index_cast %63 : i32 to index
      %65 = memref.load %arg1[%64] : memref<384xi32, #tpu.memory_space<smem>>
      %66 = arith.index_cast %65 : i32 to index
      %c0_23 = arith.constant 0 : index
      %67 = vector.load %arg2[%66, %c0_23] : memref<4104x4xf32, #tpu.memory_space<vmem>>, vector<1x4xf32>
      %c5_i32_24 = arith.constant 5 : i32
      %68 = arith.addi %16, %c5_i32_24 : i32
      %69 = arith.index_cast %68 : i32 to index
      %c0_25 = arith.constant 0 : index
      %70 = vector.load %arg3[%69, %c0_25] : memref<128x4xf32, #tpu.memory_space<vmem>>, vector<1x4xf32>
      tpu.vector_store %arg3[%69, %c0_25], %67 {strides = array<i32>} : memref<128x4xf32, #tpu.memory_space<vmem>>, vector<1x4xf32>,
      %71 = arith.addi %0, %16 : i32
      %c6_i32 = arith.constant 6 : i32
      %72 = arith.addi %71, %c6_i32 : i32
      %73 = arith.index_cast %72 : i32 to index
      %74 = memref.load %arg1[%73] : memref<384xi32, #tpu.memory_space<smem>>
      %75 = arith.index_cast %74 : i32 to index
      %c0_26 = arith.constant 0 : index
      %76 = vector.load %arg2[%75, %c0_26] : memref<4104x4xf32, #tpu.memory_space<vmem>>, vector<1x4xf32>
      %c6_i32_27 = arith.constant 6 : i32
      %77 = arith.addi %16, %c6_i32_27 : i32
      %78 = arith.index_cast %77 : i32 to index
      %c0_28 = arith.constant 0 : index
      %79 = vector.load %arg3[%78, %c0_28] : memref<128x4xf32, #tpu.memory_space<vmem>>, vector<1x4xf32>
      tpu.vector_store %arg3[%78, %c0_28], %76 {strides = array<i32>} : memref<128x4xf32, #tpu.memory_space<vmem>>, vector<1x4xf32>,
      %80 = arith.addi %0, %16 : i32
      %c7_i32 = arith.constant 7 : i32
      %81 = arith.addi %80, %c7_i32 : i32
      %82 = arith.index_cast %81 : i32 to index
      %83 = memref.load %arg1[%82] : memref<384xi32, #tpu.memory_space<smem>>
      %84 = arith.index_cast %83 : i32 to index
      %c0_29 = arith.constant 0 : index
      %85 = vector.load %arg2[%84, %c0_29] : memref<4104x4xf32, #tpu.memory_space<vmem>>, vector<1x4xf32>
      %c7_i32_30 = arith.constant 7 : i32
      %86 = arith.addi %16, %c7_i32_30 : i32
      %87 = arith.index_cast %86 : i32 to index
      %c0_31 = arith.constant 0 : index
      %88 = vector.load %arg3[%87, %c0_31] : memref<128x4xf32, #tpu.memory_space<vmem>>, vector<1x4xf32>
      tpu.vector_store %arg3[%87, %c0_31], %85 {strides = array<i32>} : memref<128x4xf32, #tpu.memory_space<vmem>>, vector<1x4xf32>,
    }
    %c16_i32_0 = arith.constant 16 : i32
    %c0 = arith.constant 0 : index
    %c0_1 = arith.constant 0 : index
    %2 = vector.load %arg3[%c0, %c0_1] : memref<128x4xf32, #tpu.memory_space<vmem>>, vector<128x4xf32>
    %3 = tpu.iota {dimensions = array<i32: 1>} : vector<128x4xi32>
    %c3_i32 = arith.constant 3 : i32
    %4 = vector.broadcast %c3_i32 : i32 to vector<128x4xi32>
    %5 = arith.cmpi eq, %3, %4 : vector<128x4xi32>
    %cst = arith.constant 0.000000e+00 : f32
    %6 = vector.broadcast %cst : f32 to vector<128x4xf32>
    %7 = arith.maximumf %2, %6 : vector<128x4xf32>
    %8 = arith.negf %2 : vector<128x4xf32>
    %9 = math.exp %8 : vector<128x4xf32>
    %cst_2 = arith.constant 1.000000e+00 : f32
    %10 = vector.broadcast %cst_2 : f32 to vector<128x4xf32>
    %11 = arith.addf %10, %9 : vector<128x4xf32>
    %12 = arith.divf %10, %11 : vector<128x4xf32>
    %13 = arith.select %5, %7, %12 : vector<128x4xi1>, vector<128x4xf32>
    %c0_3 = arith.constant 0 : index
    %c0_4 = arith.constant 0 : index
    %14 = vector.load %arg3[%c0_3, %c0_4] : memref<128x4xf32, #tpu.memory_space<vmem>>, vector<128x4xf32>
    tpu.vector_store %arg3[%c0_3, %c0_4], %13 {strides = array<i32>} : memref<128x4xf32, #tpu.memory_space<vmem>>, vector<128x4xf32>,
    return
  }
  func.func @transform_0(%arg0: i32, %arg1: memref<384xi32, #tpu.memory_space<smem>>) -> (i32, i32) {
    %c0_i32 = arith.constant 0 : i32
    %c0_i32_0 = arith.constant 0 : i32
    %c0_i32_1 = arith.constant 0 : i32
    return %c0_i32, %c0_i32_0 : i32, i32
  }
  func.func @transform_1(%arg0: i32, %arg1: memref<384xi32, #tpu.memory_space<smem>>) -> (i32, i32) {
    %c0_i32 = arith.constant 0 : i32
    %c0_i32_0 = arith.constant 0 : i32
    return %arg0, %c0_i32 : i32, i32
  }
}

</mosaic_0001>

<bundles_post_ra>
// kernel: tpu_custom_call.1
= control target key start
LH: loop header
LB: loop body
LE: loop exit
PB: predicated region body
PF: predicated region fallthrough
CT: control target
= control target key end

     0   :  { %s801_s0 = inlined_call_operand.vmem [shape: s32[384], index: 0, kind: input, shape index: {}]   ;;  %s802_s1 = inlined_call_operand.vmem [shape: f32[4104,4], index: 1, kind: input, shape index: {}]   ;;  %s803_s2 = inlined_call_operand.vmem [shape: f32[384,4], index: 2, kind: output, shape index: {}]  }
   0x1   :  { %s7_s11 = sshll.u32 %s801_s0, 4  ;;  %s8_s11 = int_to_ptr.vmem [resolvable:$true] %s7_s11 }
   0x2   :  { %s534_s12 = scalar_lea.vmem %s8_s11, 48  ;;  %s538_s13 = scalar_lea.vmem %s8_s11, 64 }
   0x3   :  { %p535_p0 = scmp.ne.s32.totalorder %s8_s11, %s534_s12  ;;  %p539_p1 = scmp.lt.s32.totalorder %s8_s11, %s8_s11 }
   0x4   :  { %p540_p2 = scmp.lt.s32.totalorder %s538_s13, %s534_s12 }
   0x6   :  { %p541_p3 = por %p540_p2, %p539_p1 }
   0x8   :  { %p542_p4 = pnand %p541_p3, %p535_p0 }
   0xa   :  { %545 = shalt.err (!%p542_p4)  }
   0xb   :  { %s564_s14 = smov [#allocation3]  }
   0xc   :  { %10 = dma.vmem_to_smem %s8_s11, 48, %s564_s14, [#allocation2] }
   0xd   :  { %554 = dma.done.wait [#allocation2], 48 }
   0xe   :  { %555 = vsyncadd [#allocation2], 4294967248 }
   0xf   :  { %12 = sfence }
  0x10   :  { %s583_s15 = smov 0  }
  0x11 LB: > { %s413_s0 = sadd.s32 4294967295, %s558_s15   ;;  %p416_p5 = scmp.ge.s32.totalorder %s558_s15, 1  ;;  %s558_s15 = sphi %s583_s15, %s18_s15  }
  0x12   : > { %p84_p6 = scmp.lt.s32.totalorder %s558_s15, 4 }
  0x14   : > { %p85_p7 = pnand %p416_p5, %p84_p6 }
  0x15   : > { %s417_s16 = sshll.u32 (!%p85_p7), %s413_s0, 4  ;;  %s591_s17 = sshll.u32 (!%p85_p7), %s413_s0, 7 }
  0x16   : > { %88 = sbr.rel (%p85_p7) target bundleno = 114 (0x72), region = 24  ;;  %p100_p8 = scmp.lt.s32.totalorder (!%p85_p7), %s417_s16, 47 }
  0x17   : > { %s598_s22 = smov (!%p85_p7), 0  }
  0x1d   : > { %s805_s16 = smov (!%p100_p8, %s417_s16), 47 }
  0x1e   : > { %s418_s18 = sshll.u32 %s805_s16, 3 }
  0x1f   : > { %s596_s21 = scalar_lea.vmem %s803_s2, %s418_s18 }
  0x20 LB: >> { %s420_s23 = sshll.u32 %s562_s22, 3  ;;  %vm118_vm0 = vcmask 24576   ;;  %s111_s22 = sadd.s32 1, %s562_s22   ;;  %s562_s22 = sphi %s598_s22, %s111_s22  }
  0x21   : >> { %s113_s24 = sadd.s32 %s420_s23, %s591_s17  ;;  %s606_s25 = scalar_lea.vmem %s596_s21, %s420_s23 }
  0x22   : >> { %s114_s26 = sld [smem:[#allocation3 + %s113_s24]]  ;;  %s120_s27 = sadd.s32 1, %s113_s24 }
  0x23   : >> { %s121_s28 = sld [smem:[#allocation3 + %s120_s27]]  ;;  %s127_s29 = sadd.s32 2, %s113_s24 }
  0x24   : >> { %s128_s30 = sld [smem:[#allocation3 + %s127_s29]]  ;;  %s134_s3 = sadd.s32 3, %s113_s24 }
  0x25   : >> { %s135_s4 = sld [smem:[#allocation3 + %s134_s3]]  ;;  %s141_s5 = sadd.s32 4, %s113_s24 }
  0x26   : >> { %s142_s6 = sld [smem:[#allocation3 + %s141_s5]]  ;;  %s148_s7 = sadd.s32 5, %s113_s24 }
  0x27   : >> { %s149_s8 = sld [smem:[#allocation3 + %s148_s7]]  ;;  %s155_s9 = sadd.s32 6, %s113_s24 }
  0x28   : >> { %s115_s12 = scalar_lea.vmem %s802_s1, %s114_s26  ;;  %s156_s13 = sld [smem:[#allocation3 + %s155_s9]] }
  0x29   : >> { %v116_v0 = vld [vmem:[%s115_s12] sm:$0x1]  ;;  %s122_s16 = scalar_lea.vmem %s802_s1, %s121_s28  ;;  %s162_s18 = sadd.s32 7, %s113_s24 }
  0x2a   : >> { %119 = vst.msk [vmem:[%s606_s25] sm:$0x1] %vm118_vm0, %v116_v0  ;;  %v123_v1 = vld [vmem:[%s122_s16] sm:$0x1]  ;;  %s129_s23 = scalar_lea.vmem %s802_s1, %s128_s30  ;;  %s163_s27 = sld [smem:[#allocation3 + %s162_s18]] }
  0x2b   : >> { %422 = vst.msk [vmem:[%s606_s25 + $0x1] sm:$0x1] %vm118_vm0, %v123_v1  ;;  %v130_v2 = vld [vmem:[%s129_s23] sm:$0x1]  ;;  %s136_s3 = scalar_lea.vmem %s802_s1, %s135_s4  ;;  %p108_p9 = scmp.ge.s32.totalorder %s111_s22, 16  }
  0x2c   : >> { %424 = vst.msk [vmem:[%s606_s25 + $0x2] sm:$0x1] %vm118_vm0, %v130_v2  ;;  %v137_v3 = vld [vmem:[%s136_s3] sm:$0x1]  ;;  %s143_s5 = scalar_lea.vmem %s802_s1, %s142_s6  ;;  %v185_v40 = vlaneseq (%p108_p9)  ;;  %vm316_vm1 = vcmask (%p108_p9), 31744  }
  0x2d   : >> { %426 = vst.msk [vmem:[%s606_s25 + $0x3] sm:$0x1] %vm118_vm0, %v137_v3  ;;  %v144_v4 = vld [vmem:[%s143_s5] sm:$0x1]  ;;  %s150_s9 = scalar_lea.vmem %s802_s1, %s149_s8  ;;  %110 = sbr.rel (!%p108_p9) target bundleno = 32 (0x20), region = 74 }
  0x2e   : >> { %428 = vst.msk [vmem:[%s606_s25 + $0x4] sm:$0x1] %vm118_vm0, %v144_v4  ;;  %v151_v5 = vld [vmem:[%s150_s9] sm:$0x1]  ;;  %s157_s4 = scalar_lea.vmem %s802_s1, %s156_s13  ;;  %v703_v49 = vand.u32 (%p108_p9), 127, %v185_v40 }
  0x2f   : >> { %430 = vst.msk [vmem:[%s606_s25 + $0x5] sm:$0x1] %vm118_vm0, %v151_v5  ;;  %v158_v6 = vld [vmem:[%s157_s4] sm:$0x1] }
  0x30   : >> { %432 = vst.msk [vmem:[%s606_s25 + $0x6] sm:$0x1] %vm118_vm0, %v158_v6  ;;  %s164_s14 = scalar_lea.vmem %s802_s1, %s163_s27  ;;  %vm187_vm2 = vcmp.eq.s32.totalorder (%p108_p9), %v703_v49, 3 }
  0x31   : >> { %v165_v7 = vld [vmem:[%s164_s14] sm:$0x1] }
  0x32   : >> { %434 = vst.msk [vmem:[%s606_s25 + $0x7] sm:$0x1] %vm118_vm0, %v165_v7 }
  0x39   : > { %v652_v8 = vld [vmem:[%s596_s21] sm:$0xff]  ;;  %v655_v9 = vld [vmem:[%s596_s21 + $0x8] sm:$0xff]  ;;  %v658_v10 = vld [vmem:[%s596_s21 + $0x10] sm:$0xff] }
  0x3a   : > { %v435_v11 = vmul.f32 -1.442695, %v652_v8  ;;  %v436_v12 = vmul.f32 -1.442695, %v655_v9  ;;  %v437_v13 = vmul.f32 -1.442695, %v658_v10 }
  0x3b   : > { %v664_v14 = vld [vmem:[%s596_s21 + $0x18] sm:$0xff]  ;;  %v667_v15 = vld [vmem:[%s596_s21 + $0x20] sm:$0xff]  ;;  %v671_v17 = vld [vmem:[%s596_s21 + $0x28] sm:$0xff]  ;;  %v188_v57 = vmax.f32 %v652_v8, 0.0  ;;  %v189_v61 = vmax.f32 %v655_v9, 0.0  ;;  %v190_v1 = vmax.f32 %v658_v10, 0.0 }
  0x3c   : > { %470 = vpow2.f32 %v435_v11  ;;  %v438_v16 = vmul.f32 -1.442695, %v664_v14  ;;  %v674_v18 = vld [vmem:[%s596_s21 + $0x30] sm:$0xff]  ;;  %v439_v19 = vmul.f32 -1.442695, %v667_v15  ;;  %v678_v20 = vld [vmem:[%s596_s21 + $0x38] sm:$0xff] }
  0x3d   : > { %472 = vpow2.f32 %v436_v12  ;;  %v681_v21 = vld [vmem:[%s596_s21 + $0x40] sm:$0xff]  ;;  %v440_v22 = vmul.f32 -1.442695, %v671_v17  ;;  %v441_v23 = vmul.f32 -1.442695, %v674_v18  ;;  %v686_v24 = vld [vmem:[%s596_s21 + $0x48] sm:$0xff] }
  0x3e   : > { %474 = vpow2.f32 %v437_v13  ;;  %v442_v25 = vmul.f32 -1.442695, %v678_v20  ;;  %v690_v26 = vld [vmem:[%s596_s21 + $0x50] sm:$0xff]  ;;  %v443_v27 = vmul.f32 -1.442695, %v681_v21  ;;  %v694_v28 = vld [vmem:[%s596_s21 + $0x58] sm:$0xff] }
  0x3f   : > { %476 = vpow2.f32 %v438_v16  ;;  %v444_v29 = vmul.f32 -1.442695, %v686_v24  ;;  %v698_v30 = vld [vmem:[%s596_s21 + $0x60] sm:$0xff]  ;;  %v445_v31 = vmul.f32 -1.442695, %v690_v26  ;;  %v706_v55 = vld [vmem:[%s596_s21 + $0x68] sm:$0xff] }
  0x40   : > { %478 = vpow2.f32 %v439_v19  ;;  %v446_v32 = vmul.f32 -1.442695, %v694_v28  ;;  %v447_v33 = vmul.f32 -1.442695, %v698_v30  ;;  %v710_v59 = vld [vmem:[%s596_s21 + $0x70] sm:$0xff]  ;;  %v715_v63 = vld [vmem:[%s596_s21 + $0x78] sm:$0xff] }
  0x41   : > { %480 = vpow2.f32 %v440_v22  ;;  %v448_v3 = vmul.f32 -1.442695, %v706_v55  ;;  %v191_v5 = vmax.f32 %v664_v14, 0.0  ;;  %v449_v7 = vmul.f32 -1.442695, %v710_v59 }
  0x42   : > { %482 = vpow2.f32 %v441_v23  ;;  %v192_v11 = vmax.f32 %v667_v15, 0.0  ;;  %v450_v10 = vmul.f32 -1.442695, %v715_v63  ;;  %v193_v14 = vmax.f32 %v671_v17, 0.0 }
  0x43   : > { %484 = vpow2.f32 %v442_v25  ;;  %v194_v19 = vmax.f32 %v674_v18, 0.0  ;;  %v195_v17 = vmax.f32 %v678_v20, 0.0  ;;  %v196_v18 = vmax.f32 %v681_v21, 0.0 }
  0x44   : > { %486 = vpow2.f32 %v443_v27  ;;  %v197_v20 = vmax.f32 %v686_v24, 0.0 }
  0x45   : > { %488 = vpow2.f32 %v444_v29 }
  0x46   : > { %v471_v34 = vpop.eup %470  ;;  %490 = vpow2.f32 %v445_v31 }
  0x47   : > { %v473_v35 = vpop.eup %472  ;;  %v252_v36 = vadd.f32 1.0, %v471_v34  ;;  %492 = vpow2.f32 %v446_v32  ;;  %v198_v34 = vmax.f32 %v690_v26, 0.0 }
  0x48   : > { %v475_v37 = vpop.eup %474  ;;  %v253_v38 = vadd.f32 1.0, %v473_v35  ;;  %494 = vpow2.f32 %v447_v33 }
  0x49   : > { %v477_v39 = vpop.eup %476  ;;  %496 = vrcp.f32 %v252_v36  ;;  %v254_v41 = vadd.f32 1.0, %v475_v37  ;;  %v199_v36 = vmax.f32 %v694_v28, 0.0 }
  0x4a   : > { %v479_v42 = vpop.eup %478  ;;  %498 = vrcp.f32 %v253_v38  ;;  %v255_v43 = vadd.f32 1.0, %v477_v39  ;;  %v200_v38 = vmax.f32 %v698_v30, 0.0 }
  0x4b   : > { %v481_v44 = vpop.eup %480  ;;  %500 = vrcp.f32 %v254_v41  ;;  %v256_v45 = vadd.f32 1.0, %v479_v42 }
  0x4c   : > { %v483_v46 = vpop.eup %482  ;;  %502 = vrcp.f32 %v255_v43  ;;  %v257_v47 = vadd.f32 1.0, %v481_v44 }
  0x4d   : > { %v485_v48 = vpop.eup %484  ;;  %504 = vrcp.f32 %v256_v45  ;;  %v258_v50 = vadd.f32 1.0, %v483_v46 }
  0x4e   : > { %v487_v51 = vpop.eup %486  ;;  %506 = vrcp.f32 %v257_v47  ;;  %v259_v52 = vadd.f32 1.0, %v485_v48 }
  0x4f   : > { %v489_v53 = vpop.eup %488  ;;  %508 = vrcp.f32 %v258_v50  ;;  %v260_v54 = vadd.f32 1.0, %v487_v51  ;;  %v201_v50 = vmax.f32 %v706_v55, 0.0  ;;  %v202_v51 = vmax.f32 %v710_v59, 0.0 }
  0x50   : > { %v491_v56 = vpop.eup %490  ;;  %510 = vrcp.f32 %v259_v52  ;;  %v261_v58 = vadd.f32 1.0, %v489_v53  ;;  %v203_v52 = vmax.f32 %v715_v63, 0.0 }
  0x51   : > { %v493_v60 = vpop.eup %492  ;;  %512 = vrcp.f32 %v260_v54  ;;  %v262_v62 = vadd.f32 1.0, %v491_v56 }
  0x52   : > { %v495_v0 = vpop.eup %494  ;;  %514 = vrcp.f32 %v261_v58  ;;  %v263_v2 = vadd.f32 1.0, %v493_v60 }
  0x53   : > { %v497_v4 = vpop.eup %496  ;;  %516 = vrcp.f32 %v262_v62  ;;  %v264_v6 = vadd.f32 1.0, %v495_v0 }
  0x54   : > { %v499_v8 = vpop.eup %498  ;;  %v300_v9 = vsel %vm187_vm2, %v188_v57, %v497_v4  ;;  %518 = vrcp.f32 %v263_v2 }
  0x55   : > { %v501_v12 = vpop.eup %500  ;;  %317 = vst.msk [vmem:[%s596_s21] sm:$0xff] %vm316_vm1, %v300_v9  ;;  %v301_v13 = vsel %vm187_vm2, %v189_v61, %v499_v8  ;;  %520 = vrcp.f32 %v264_v6 }
  0x56   : > { %v503_v16 = vpop.eup %502  ;;  %318 = vst.msk [vmem:[%s596_s21 + $0x8] sm:$0xff] %vm316_vm1, %v301_v13  ;;  %v302_v15 = vsel %vm187_vm2, %v190_v1, %v501_v12  ;;  %522 = vpow2.f32 %v448_v3 }
  0x57   : > { %v505_v22 = vpop.eup %504  ;;  %319 = vst.msk [vmem:[%s596_s21 + $0x10] sm:$0xff] %vm316_vm1, %v302_v15  ;;  %v303_v23 = vsel %vm187_vm2, %v191_v5, %v503_v16  ;;  %524 = vpow2.f32 %v449_v7 }
  0x58   : > { %v507_v25 = vpop.eup %506  ;;  %320 = vst.msk [vmem:[%s596_s21 + $0x18] sm:$0xff] %vm316_vm1, %v303_v23  ;;  %v304_v27 = vsel %vm187_vm2, %v192_v11, %v505_v22  ;;  %526 = vpow2.f32 %v450_v10 }
  0x59   : > { %v509_v29 = vpop.eup %508  ;;  %321 = vst.msk [vmem:[%s596_s21 + $0x20] sm:$0xff] %vm316_vm1, %v304_v27  ;;  %v305_v31 = vsel %vm187_vm2, %v193_v14, %v507_v25 }
  0x5a   : > { %v511_v32 = vpop.eup %510  ;;  %322 = vst.msk [vmem:[%s596_s21 + $0x28] sm:$0xff] %vm316_vm1, %v305_v31  ;;  %v306_v33 = vsel %vm187_vm2, %v194_v19, %v509_v29 }
  0x5b   : > { %v513_v21 = vpop.eup %512  ;;  %323 = vst.msk [vmem:[%s596_s21 + $0x30] sm:$0xff] %vm316_vm1, %v306_v33  ;;  %v307_v35 = vsel %vm187_vm2, %v195_v17, %v511_v32 }
  0x5c   : > { %v515_v24 = vpop.eup %514  ;;  %324 = vst.msk [vmem:[%s596_s21 + $0x38] sm:$0xff] %vm316_vm1, %v307_v35  ;;  %v308_v37 = vsel %vm187_vm2, %v196_v18, %v513_v21 }
  0x5d   : > { %v517_v26 = vpop.eup %516  ;;  %325 = vst.msk [vmem:[%s596_s21 + $0x40] sm:$0xff] %vm316_vm1, %v308_v37  ;;  %v309_v39 = vsel %vm187_vm2, %v197_v20, %v515_v24 }
  0x5e   : > { %v519_v40 = vpop.eup %518  ;;  %326 = vst.msk [vmem:[%s596_s21 + $0x48] sm:$0xff] %vm316_vm1, %v309_v39  ;;  %v310_v28 = vsel %vm187_vm2, %v198_v34, %v517_v26 }
  0x5f   : > { %v521_v41 = vpop.eup %520  ;;  %327 = vst.msk [vmem:[%s596_s21 + $0x50] sm:$0xff] %vm316_vm1, %v310_v28  ;;  %v311_v42 = vsel %vm187_vm2, %v199_v36, %v519_v40 }
  0x60   : > { %v523_v43 = vpop.eup %522  ;;  %328 = vst.msk [vmem:[%s596_s21 + $0x58] sm:$0xff] %vm316_vm1, %v311_v42  ;;  %v312_v30 = vsel %vm187_vm2, %v200_v38, %v521_v41 }
  0x61   : > { %v525_v44 = vpop.eup %524  ;;  %329 = vst.msk [vmem:[%s596_s21 + $0x60] sm:$0xff] %vm316_vm1, %v312_v30  ;;  %v265_v45 = vadd.f32 1.0, %v523_v43 }
  0x62   : > { %v527_v46 = vpop.eup %526  ;;  %v266_v47 = vadd.f32 1.0, %v525_v44 }
  0x63   : > { %528 = vrcp.f32 %v265_v45  ;;  %v267_v48 = vadd.f32 1.0, %v527_v46 }
  0x64   : > { %530 = vrcp.f32 %v266_v47 }
  0x65   : > { %532 = vrcp.f32 %v267_v48 }
  0x6d   : > { %v529_v53 = vpop.eup %528 }
  0x6e   : > { %v531_v54 = vpop.eup %530  ;;  %v313_v56 = vsel %vm187_vm2, %v201_v50, %v529_v53 }
  0x6f   : > { %v533_v57 = vpop.eup %532  ;;  %330 = vst.msk [vmem:[%s596_s21 + $0x68] sm:$0xff] %vm316_vm1, %v313_v56  ;;  %v314_v58 = vsel %vm187_vm2, %v202_v51, %v531_v54 }
  0x70   : > { %331 = vst.msk [vmem:[%s596_s21 + $0x70] sm:$0xff] %vm316_vm1, %v314_v58  ;;  %v315_v55 = vsel %vm187_vm2, %v203_v52, %v533_v57 }
  0x71   : > { %332 = vst.msk [vmem:[%s596_s21 + $0x78] sm:$0xff] %vm316_vm1, %v315_v55 }
  0x72 PF: > { %s18_s15 = sadd.s32 1, %s558_s15  }
  0x73   : > { %p15_p10 = scmp.ge.s32.totalorder %s18_s15, 5  }
  0x75   :  { %17 = sbr.rel (!%p15_p10) target bundleno = 17 (0x11), region = 85 }

</bundles_post_ra>
